<compile_context>
chip_gen: v7x
topology: tpu7x:2x2x1
jax: 0.10.0
libtpu: 0.0.40
codegen_flags: <defaults>
</compile_context>

<pallas_src>
import math

import jax
import jax.numpy as jnp
from jax.experimental import pallas as pl
from jax.experimental.pallas import tpu as pltpu

# Small, self-consistent synthetic config (mirrors args.* in the module).
B, D, H = 128, 32, 32          # batch, feature dim, hidden dim
POS_WEIGHT = 3.0               # args.numberOfNonSpammer / args.numberOfSpammer
THRESHOLD = 0.5                # args.threshold
# sigmoid(x) > t  <=>  x > logit(t); for t = 0.5 this is simply x > 0.
THRESHOLD_LOGIT = math.log(THRESHOLD / (1.0 - THRESHOLD))


def _trainer_kernel(xT_ref, w1T_ref, b1_ref, w2_ref, b2_ref, y_ref, out_ref):
    """Single-shot fused forward.

    Inputs (all full-array blocks, no grid):
      xT_ref  : [D, B]  transposed features (VMEM)
      w1T_ref : [H, D]  transposed first-layer weight (VMEM)
      b1_ref  : [H, 1]  first-layer bias column (VMEM)
      w2_ref  : [H, 1]  second-layer weight column (VMEM)
      b2_ref  : [1, 1]  second-layer bias scalar (SMEM)
      y_ref   : [1, B]  labels as a lane-dense row (VMEM)
    Output:
      out_ref : [1, 128] lane 0 = Σ per-example loss, lane 1 = Σ pred,
                lane 2 = Σ y, lane 3 = Σ (y·pred); remaining lanes 0.
    """
    xT = xT_ref[...]                      # [D, B]
    w1T = w1T_ref[...]                    # [H, D]
    b1 = b1_ref[...]                      # [H, 1]
    w2 = w2_ref[...]                      # [H, 1]
    b2 = b2_ref[0, 0]                     # f32 scalar from SMEM
    y = y_ref[...]                        # [1, B] float {0, 1}

    # --- MultiTaskModel stand-in: 2-layer MLP, batch on lanes ---------------
    # h^T = W1^T x^T on the MXU (f32 kept for exact parity at these shapes;
    # bf16 inputs only pay off once D/H make the matmul dominant).
    h = jnp.dot(w1T, xT, preferred_element_type=jnp.float32) + b1     # [H, B]
    h = jnp.where(h > 0.0, h, 0.2 * h)    # leaky_relu(0.2), matches weight_init

    # Second layer has N=1 -> keep it off the MXU: VPU multiply + ONE sublane
    # reduce over H gives a lane-dense [1, B] logits row.
    logits = jnp.sum(h * w2, axis=0, keepdims=True) + b2              # [1, B]

    # --- BCEWithLogitsLoss(pos_weight) per-example terms (lane-dense) -------
    # stable softplus(-x) = max(-x, 0) + log(1 + exp(-|x|))
    sp_negx = jnp.maximum(-logits, 0.0) + jnp.log(1.0 + jnp.exp(-jnp.abs(logits)))
    per = POS_WEIGHT * y * sp_negx + (1.0 - y) * (logits + sp_negx)   # [1, B]

    # --- thresholded prediction (no sigmoid needed) --------------------------
    pred = (logits > THRESHOLD_LOGIT).astype(jnp.float32)             # [1, B]
    yp = y * pred                                                     # [1, B]

    # Four lane reductions; fp/fn/tn/accuracy and 1/B scaling are derived in
    # the wrapper from these raw sums.
    s_per = jnp.sum(per, axis=1, keepdims=True)                       # [1, 1]
    s_pred = jnp.sum(pred, axis=1, keepdims=True)
    s_y = jnp.sum(y, axis=1, keepdims=True)
    s_yp = jnp.sum(yp, axis=1, keepdims=True)

    lane = jax.lax.broadcasted_iota(jnp.int32, (1, 128), 1)
    out_ref[...] = (jnp.where(lane == 0, s_per, 0.0)
                    + jnp.where(lane == 1, s_pred, 0.0)
                    + jnp.where(lane == 2, s_y, 0.0)
                    + jnp.where(lane == 3, s_yp, 0.0))


def multitask_trainer_forward(x, label, w1, b1, w2, b2):
    """Returns (loss, accuracy, confusion_matrix[2,2] int32)."""
    # Layout plumbing in the wrapper (free XLA work): batch onto lanes.
    xT = x.T                              # [D, B]
    w1T = w1.T                            # [H, D]
    b1_col = b1.reshape(H, 1)
    w2_col = w2.reshape(H, 1)
    b2_11 = b2.reshape(1, 1)
    y_row = label.reshape(1, B).astype(jnp.float32)

    out = pl.pallas_call(
        _trainer_kernel,
        out_shape=jax.ShapeDtypeStruct((1, 128), jnp.float32),
        in_specs=[
            pl.BlockSpec(memory_space=pltpu.MemorySpace.VMEM),   # xT  [D, B]
            pl.BlockSpec(memory_space=pltpu.MemorySpace.VMEM),   # w1T [H, D]
            pl.BlockSpec(memory_space=pltpu.MemorySpace.VMEM),   # b1  [H, 1]
            pl.BlockSpec(memory_space=pltpu.MemorySpace.VMEM),   # w2  [H, 1]
            pl.BlockSpec(memory_space=pltpu.MemorySpace.SMEM),   # b2  (1, 1)
            pl.BlockSpec(memory_space=pltpu.MemorySpace.VMEM),   # y   [1, B]
        ],
        out_specs=pl.BlockSpec(memory_space=pltpu.MemorySpace.VMEM),
        # Footprint is tiny (<100 KiB) — fits default scoped VMEM on
        # v5e/v6e/v7x.  If B/D/H scale, reintroduce a batch grid sized against
        # the per-chip VMEM (v7x: 64 MiB phys / 32 MiB scoped), set
        # vmem_limit_bytes, and make the batch axis "parallel" to use v7x's
        # two TensorCores.
    )(xT, w1T, b1_col, w2_col, b2_11, y_row)

    s_per, s_pred, s_y, s_yp = out[0, 0], out[0, 1], out[0, 2], out[0, 3]

    loss = s_per / B
    tp = s_yp
    fp = s_pred - s_yp
    fn = s_y - s_yp
    tn = B - s_pred - s_y + s_yp
    acc = (tp + tn) / B
    cm = jnp.stack([jnp.stack([tn, fp]), jnp.stack([fn, tp])]).astype(jnp.int32)
    return loss, acc, cm


def _reference(x, label, w1, b1, w2, b2):
    y = label.reshape(B, 1).astype(jnp.float32)
    h = x @ w1.astype(jnp.float32) + b1.reshape(1, H)
    h = jnp.where(h > 0.0, h, 0.2 * h)
    logits = h @ w2 + b2.reshape(1, 1)
    sp = jnp.maximum(-logits, 0.0) + jnp.log(1.0 + jnp.exp(-jnp.abs(logits)))
    per = POS_WEIGHT * y * sp + (1.0 - y) * (logits + sp)
    loss = jnp.mean(per)
    pred = (jax.nn.sigmoid(logits) > THRESHOLD).astype(jnp.float32)
    acc = jnp.mean((pred == y).astype(jnp.float32))
    tn = jnp.sum((1 - y) * (1 - pred)); fp = jnp.sum((1 - y) * pred)
    fn = jnp.sum(y * (1 - pred));       tp = jnp.sum(y * pred)
    cm = jnp.array([[tn, fp], [fn, tp]], dtype=jnp.int32)
    return loss, acc, cm


if __name__ == "__main__":
    key = jax.random.PRNGKey(0)
    kx, ky, k1, k2 = jax.random.split(key, 4)

    # Deterministic Kaiming-normal init (a=0.2, leaky_relu) as in weight_init.
    gain = math.sqrt(2.0 / (1.0 + 0.2 ** 2))
    w1 = (gain / math.sqrt(D)) * jax.random.normal(k1, (D, H), jnp.float32)
    b1 = jnp.zeros((H,), jnp.float32)
    w2 = (gain / math.sqrt(H)) * jax.random.normal(k2, (H, 1), jnp.float32)
    b2 = jnp.zeros((1,), jnp.float32)

    x = jax.random.normal(kx, (B, D), jnp.float32)
    label = jax.random.bernoulli(ky, 0.5, (B,)).astype(jnp.float32)

    loss, acc, cm = multitask_trainer_forward(x, label, w1, b1, w2, b2)
    jax.block_until_ready((loss, acc, cm))

    # Correctness check against a pure-JAX reference of the same forward.
    rloss, racc, rcm = _reference(x, label, w1, b1, w2, b2)
    assert jnp.allclose(loss, rloss, atol=1e-5, rtol=1e-5), (loss, rloss)
    assert jnp.allclose(acc, racc, atol=1e-6), (acc, racc)
    assert jnp.array_equal(cm, rcm), (cm, rcm)

    print("KERNEL_OK")
</pallas_src>

<mosaic_0001>
module attributes {stable_mosaic.version = 11 : i64} {
  func.func @_trainer_kernel(%arg0: memref<32x128xf32, #tpu.memory_space<vmem>>, %arg1: memref<32x32xf32, #tpu.memory_space<vmem>>, %arg2: memref<32x1xf32, #tpu.memory_space<vmem>>, %arg3: memref<32x1xf32, #tpu.memory_space<vmem>>, %arg4: memref<1x1xf32, #tpu.memory_space<smem>>, %arg5: memref<1x128xf32, #tpu.memory_space<vmem>>, %arg6: memref<1x128xf32, #tpu.memory_space<vmem>>) attributes {dimension_semantics = [], scalar_prefetch = 0 : i64, scratch_operands = 0 : i64, tpu.core_type = #tpu.core_type<tc>} {
    %c0 = arith.constant 0 : index
    %c0_0 = arith.constant 0 : index
    %0 = vector.load %arg0[%c0, %c0_0] : memref<32x128xf32, #tpu.memory_space<vmem>>, vector<32x128xf32>
    %c0_1 = arith.constant 0 : index
    %c0_2 = arith.constant 0 : index
    %1 = vector.load %arg1[%c0_1, %c0_2] : memref<32x32xf32, #tpu.memory_space<vmem>>, vector<32x32xf32>
    %c0_3 = arith.constant 0 : index
    %c0_4 = arith.constant 0 : index
    %2 = vector.load %arg2[%c0_3, %c0_4] : memref<32x1xf32, #tpu.memory_space<vmem>>, vector<32x1xf32>
    %c0_5 = arith.constant 0 : index
    %c0_6 = arith.constant 0 : index
    %3 = vector.load %arg3[%c0_5, %c0_6] : memref<32x1xf32, #tpu.memory_space<vmem>>, vector<32x1xf32>
    %c0_7 = arith.constant 0 : index
    %c0_8 = arith.constant 0 : index
    %4 = memref.load %arg4[%c0_7, %c0_8] : memref<1x1xf32, #tpu.memory_space<smem>>
    %c0_9 = arith.constant 0 : index
    %c0_10 = arith.constant 0 : index
    %5 = vector.load %arg5[%c0_9, %c0_10] : memref<1x128xf32, #tpu.memory_space<vmem>>, vector<1x128xf32>
    %cst = arith.constant dense<0.000000e+00> : vector<32x128xf32>
    %6 = tpu.matmul %1, %0, %cst {dimension_numbers = #tpu.dot_dimension_numbers<[1], [0], [0], [1], [0, 0, 1, 1], [], []>} : vector<32x32xf32>, vector<32x128xf32>, vector<32x128xf32> -> vector<32x128xf32>
    %7 = vector.broadcast %2 : vector<32x1xf32> to vector<32x128xf32>
    %8 = arith.addf %6, %7 : vector<32x128xf32>
    %cst_11 = arith.constant 0.000000e+00 : f32
    %9 = vector.broadcast %cst_11 : f32 to vector<32x128xf32>
    %10 = arith.cmpf ogt, %8, %9 : vector<32x128xf32>
    %cst_12 = arith.constant 2.000000e-01 : f32
    %11 = vector.broadcast %cst_12 : f32 to vector<32x128xf32>
    %12 = arith.mulf %11, %8 : vector<32x128xf32>
    %13 = arith.select %10, %8, %12 : vector<32x128xi1>, vector<32x128xf32>
    %14 = vector.broadcast %3 : vector<32x1xf32> to vector<32x128xf32>
    %15 = arith.mulf %13, %14 : vector<32x128xf32>
    %cst_13 = arith.constant dense<0.000000e+00> : vector<128xf32>
    %16 = vector.multi_reduction <add>, %15, %cst_13 [0] : vector<32x128xf32> to vector<128xf32>
    %17 = vector.shape_cast %16 : vector<128xf32> to vector<1x128xf32>
    %18 = vector.broadcast %4 : f32 to vector<1x128xf32>
    %19 = arith.addf %17, %18 : vector<1x128xf32>
    %cst_14 = arith.constant 0.000000e+00 : f32
    %20 = vector.broadcast %cst_14 : f32 to vector<1x128xf32>
    %21 = arith.subf %20, %19 : vector<1x128xf32>
    %cst_15 = arith.constant 0.000000e+00 : f32
    %22 = vector.broadcast %cst_15 : f32 to vector<1x128xf32>
    %23 = arith.maximumf %21, %22 : vector<1x128xf32>
    %24 = math.absf %19 : vector<1x128xf32>
    %cst_16 = arith.constant 0.000000e+00 : f32
    %25 = vector.broadcast %cst_16 : f32 to vector<1x128xf32>
    %26 = arith.subf %25, %24 : vector<1x128xf32>
    %27 = math.exp %26 : vector<1x128xf32>
    %cst_17 = arith.constant 1.000000e+00 : f32
    %28 = vector.broadcast %cst_17 : f32 to vector<1x128xf32>
    %29 = arith.addf %28, %27 : vector<1x128xf32>
    %30 = math.log %29 : vector<1x128xf32>
    %31 = arith.addf %23, %30 : vector<1x128xf32>
    %cst_18 = arith.constant 3.000000e+00 : f32
    %32 = vector.broadcast %cst_18 : f32 to vector<1x128xf32>
    %33 = arith.mulf %32, %5 : vector<1x128xf32>
    %34 = arith.mulf %33, %31 : vector<1x128xf32>
    %cst_19 = arith.constant 1.000000e+00 : f32
    %35 = vector.broadcast %cst_19 : f32 to vector<1x128xf32>
    %36 = arith.subf %35, %5 : vector<1x128xf32>
    %37 = arith.addf %19, %31 : vector<1x128xf32>
    %38 = arith.mulf %36, %37 : vector<1x128xf32>
    %39 = arith.addf %34, %38 : vector<1x128xf32>
    %cst_20 = arith.constant 0.000000e+00 : f32
    %40 = vector.broadcast %cst_20 : f32 to vector<1x128xf32>
    %41 = arith.cmpf ogt, %19, %40 : vector<1x128xf32>
    %42 = arith.extui %41 : vector<1x128xi1> to vector<1x128xi32>
    %43 = arith.sitofp %42 : vector<1x128xi32> to vector<1x128xf32>
    %44 = arith.mulf %5, %43 : vector<1x128xf32>
    %cst_21 = arith.constant dense<0.000000e+00> : vector<1xf32>
    %45 = vector.multi_reduction <add>, %39, %cst_21 [1] : vector<1x128xf32> to vector<1xf32>
    %46 = vector.shape_cast %45 : vector<1xf32> to vector<1x1xf32>
    %cst_22 = arith.constant dense<0.000000e+00> : vector<1xf32>
    %47 = vector.multi_reduction <add>, %43, %cst_22 [1] : vector<1x128xf32> to vector<1xf32>
    %48 = vector.shape_cast %47 : vector<1xf32> to vector<1x1xf32>
    %cst_23 = arith.constant dense<0.000000e+00> : vector<1xf32>
    %49 = vector.multi_reduction <add>, %5, %cst_23 [1] : vector<1x128xf32> to vector<1xf32>
    %50 = vector.shape_cast %49 : vector<1xf32> to vector<1x1xf32>
    %cst_24 = arith.constant dense<0.000000e+00> : vector<1xf32>
    %51 = vector.multi_reduction <add>, %44, %cst_24 [1] : vector<1x128xf32> to vector<1xf32>
    %52 = vector.shape_cast %51 : vector<1xf32> to vector<1x1xf32>
    %53 = tpu.iota {dimensions = array<i32: 1>} : vector<1x128xi32>
    %c0_i32 = arith.constant 0 : i32
    %54 = vector.broadcast %c0_i32 : i32 to vector<1x128xi32>
    %55 = arith.cmpi eq, %53, %54 : vector<1x128xi32>
    %cst_25 = arith.constant 0.000000e+00 : f32
    %56 = vector.shape_cast %46 : vector<1x1xf32> to vector<1x1xf32>
    %57 = vector.broadcast %56 : vector<1x1xf32> to vector<1x128xf32>
    %58 = vector.broadcast %cst_25 : f32 to vector<1x128xf32>
    %59 = arith.select %55, %57, %58 : vector<1x128xi1>, vector<1x128xf32>
    %c1_i32 = arith.constant 1 : i32
    %60 = vector.broadcast %c1_i32 : i32 to vector<1x128xi32>
    %61 = arith.cmpi eq, %53, %60 : vector<1x128xi32>
    %cst_26 = arith.constant 0.000000e+00 : f32
    %62 = vector.shape_cast %48 : vector<1x1xf32> to vector<1x1xf32>
    %63 = vector.broadcast %62 : vector<1x1xf32> to vector<1x128xf32>
    %64 = vector.broadcast %cst_26 : f32 to vector<1x128xf32>
    %65 = arith.select %61, %63, %64 : vector<1x128xi1>, vector<1x128xf32>
    %66 = arith.addf %59, %65 : vector<1x128xf32>
    %c2_i32 = arith.constant 2 : i32
    %67 = vector.broadcast %c2_i32 : i32 to vector<1x128xi32>
    %68 = arith.cmpi eq, %53, %67 : vector<1x128xi32>
    %cst_27 = arith.constant 0.000000e+00 : f32
    %69 = vector.shape_cast %50 : vector<1x1xf32> to vector<1x1xf32>
    %70 = vector.broadcast %69 : vector<1x1xf32> to vector<1x128xf32>
    %71 = vector.broadcast %cst_27 : f32 to vector<1x128xf32>
    %72 = arith.select %68, %70, %71 : vector<1x128xi1>, vector<1x128xf32>
    %73 = arith.addf %66, %72 : vector<1x128xf32>
    %c3_i32 = arith.constant 3 : i32
    %74 = vector.broadcast %c3_i32 : i32 to vector<1x128xi32>
    %75 = arith.cmpi eq, %53, %74 : vector<1x128xi32>
    %cst_28 = arith.constant 0.000000e+00 : f32
    %76 = vector.shape_cast %52 : vector<1x1xf32> to vector<1x1xf32>
    %77 = vector.broadcast %76 : vector<1x1xf32> to vector<1x128xf32>
    %78 = vector.broadcast %cst_28 : f32 to vector<1x128xf32>
    %79 = arith.select %75, %77, %78 : vector<1x128xi1>, vector<1x128xf32>
    %80 = arith.addf %73, %79 : vector<1x128xf32>
    %c0_29 = arith.constant 0 : index
    %c0_30 = arith.constant 0 : index
    %81 = vector.load %arg6[%c0_29, %c0_30] : memref<1x128xf32, #tpu.memory_space<vmem>>, vector<1x128xf32>
    tpu.vector_store %arg6[%c0_29, %c0_30], %80 {strides = array<i32>} : memref<1x128xf32, #tpu.memory_space<vmem>>, vector<1x128xf32>,
    return
  }
}

</mosaic_0001>

<bundles_post_ra>
// kernel: tpu_custom_call.1
= control target key start
LH: loop header
LB: loop body
LE: loop exit
PB: predicated region body
PF: predicated region fallthrough
CT: control target
= control target key end

     0   :  { %vm63_vm0 = vcmask 261120   ;;  %v340_v7 = vmov 0   ;;  %s457_s0 = inlined_call_operand.vmem [shape: f32[32,128], index: 0, kind: input, shape index: {}]   ;;  %s458_s1 = inlined_call_operand.vmem [shape: f32[32,32], index: 1, kind: input, shape index: {}]   ;;  %s459_s2 = inlined_call_operand.vmem [shape: f32[32,1], index: 2, kind: input, shape index: {}]   ;;  %s460_s3 = inlined_call_operand.vmem [shape: f32[32,1], index: 3, kind: input, shape index: {}]   ;;  %s461_s4 = inlined_call_operand.<no memory space> [shape: f32[1,1], index: 4, kind: input, shape index: {}]   ;;  %s462_s5 = inlined_call_operand.vmem [shape: f32[1,128], index: 5, kind: input, shape index: {}]   ;;  %s463_s6 = inlined_call_operand.hbm [shape: f32[1,128], index: 6, kind: output, shape index: {}]  }
   0x1   :  { %v25_v0 = vld [vmem:[%s457_s0] sm:$0xff]  ;;  %v26_v1 = vld [vmem:[%s457_s0 + $0x8] sm:$0xff]  ;;  %v27_v2 = vld [vmem:[%s457_s0 + $0x10] sm:$0xff]  ;;  %310 = vset.pattern.permute.xlu0 %v340_v7  ;;  %311 = vset.pattern.permute.xlu1 %v340_v7 }
   0x2   :  { %v295_v3 = vpack.c.bf16 %v26_v1, %v25_v0  ;;  %v28_v4 = vld [vmem:[%s457_s0 + $0x18] sm:$0xff]  ;;  %v29_v5 = vld [vmem:[%s458_s1] sm:$0xff]  ;;  %v31_v6 = vld [vmem:[%s458_s1 + $0x10] sm:$0xff] }
   0x3   :  { %v299_v8 = vpack.c.bf16 %v28_v4, %v27_v2  ;;  %289 = vmatprep.mubr.msk.f32.mxu0 %vm63_vm0, %v29_v5  ;;  %292 = vmatprep.mubr.msk.f32.mxu1 %vm63_vm0, %v31_v6  ;;  %v33_v9 = vld [vmem:[%s459_s2] sm:$0xff]  ;;  %v35_v10 = vld [vmem:[%s459_s2 + $0x10] sm:$0xff] }
   0x4   :  { %296 = vmatprep.subr.bf16.mxu0 %v295_v3  ;;  %303 = vmatprep.subr.bf16.mxu1 %v295_v3 }
   0x5   :  { %298 = vmatpush3.bf16.msra.mxu0 %v295_v3  ;;  %305 = vmatpush3.bf16.msra.mxu1 %v295_v3 }
   0x6   :  { %300 = vmatprep.subr.bf16.mxu0 %v299_v8  ;;  %304 = vmatprep.subr.bf16.mxu1 %v299_v8 }
   0x7   :  { %12 = vsyncpa [#allocation4], 0  ;;  %45 = vperm.xlu0 %310, %v33_v9   ;;  %55 = vperm.xlu1 %311, %v35_v10   ;;  %v34_v11 = vld [vmem:[%s459_s2 + $0x8] sm:$0xff]  ;;  %v36_v12 = vld [vmem:[%s459_s2 + $0x18] sm:$0xff]  ;;  %vm228_vm1 = vcmask 1040384   ;;  %v206_v57 = vstv %s461_s4  ;;  %v341_v61 = vmov 0.0  }
   0x8   :  { %v30_v13 = vld [vmem:[%s458_s1 + $0x8] sm:$0xff]  ;;  %v32_v14 = vld [vmem:[%s458_s1 + $0x18] sm:$0xff]  ;;  %v37_v15 = vld [vmem:[%s460_s3] sm:$0xff]  ;;  %s342_s4 = smov [#allocation3]  }
   0x9   :  { %302 = vmatpush3.bf16.msra.mxu0 %v299_v8  ;;  %306 = vmatpush3.bf16.msra.mxu1 %v299_v8  ;;  %v38_v16 = vld [vmem:[%s460_s3 + $0x8] sm:$0xff]  ;;  %v39_v17 = vld [vmem:[%s460_s3 + $0x10] sm:$0xff]  ;;  %v40_v18 = vld [vmem:[%s460_s3 + $0x18] sm:$0xff]  ;;  %s260_s28 = sshll.u32 %s342_s4, 4  ;;  %s261_s28 = int_to_ptr.vmem [resolvable:$true] %s260_s28 }
   0xa   :  { %v433_v19 = vld [vmem:[%s462_s5] sm:$0x1]  ;;  %s316_s29 = scalar_lea.vmem %s261_s28, 16  ;;  %s320_s30 = scalar_lea.vmem %s261_s28, 32 }
   0xb   :  { %50 = vperm.xlu0 %310, %v34_v11   ;;  %60 = vperm.xlu1 %311, %v36_v12   ;;  %v234_v20 = vsel %vm228_vm1, %v433_v19, 0.0  ;;  %v218_v8 = vmul.f32 3.0, %v433_v19  ;;  %v220_v9 = vsub.f32 1.0, %v433_v19  ;;  %p317_p0 = scmp.ne.s32.totalorder %s261_s28, %s316_s29  ;;  %p321_p1 = scmp.lt.s32.totalorder %s261_s28, %s261_s28 }
   0xc   :  { %290 = vmatmul.mubr.msk.f32.vlgmr.msra.gmra.mrb[0].mxu0 %vm63_vm0, %v30_v13  ;;  %293 = vmatmul.mubr.msk.f32.vlgmr.msra.gmra.mrb[0].mxu1 %vm63_vm0, %v32_v14  ;;  %p322_p2 = scmp.lt.s32.totalorder %s320_s30, %s316_s29 }
   0xe   :  { %p323_p3 = por %p322_p2, %p321_p1 }
   0xf   :  { %175 = vperm.xlu0 %310, %v37_v15   ;;  %180 = vperm.xlu1 %311, %v38_v16  }
  0x10   :  { %p324_p4 = pnand %p323_p3, %p317_p0 }
  0x13   :  { %185 = vperm.xlu0 %310, %v39_v17   ;;  %190 = vperm.xlu1 %311, %v40_v18   ;;  %v240_v17 = vlaneseq }
  0x15   :  { %v241_v18 = vand.u32 127, %v240_v17 }
  0x17   :  { %vm244_vm7 = vcmp.eq.s32.totalorder %v241_v18, 1  ;;  %vm242_vm8 = vcmp.eq.s32.totalorder %v241_v18, 0  ;;  %vm247_vm9 = vcmp.eq.s32.totalorder %v241_v18, 2  ;;  %vm250_vm10 = vcmp.eq.s32.totalorder %v241_v18, 3 }
  0x32   :  { %235 = vadd.xlane.f32.xlu0 %v234_v20 }
  0x86   :  { %v46_v21 = vpop.permute.xlu0 %45  ;;  %v56_v22 = vpop.permute.xlu1 %55 }
  0x8a   :  { %v51_v23 = vpop.permute.xlu0 %50  ;;  %v61_v24 = vpop.permute.xlu1 %60 }
  0x8e   :  { %v176_v31 = vpop.permute.xlu0 %175  ;;  %v181_v36 = vpop.permute.xlu1 %180 }
  0x92   :  { %v186_v44 = vpop.permute.xlu0 %185  ;;  %v191_v48 = vpop.permute.xlu1 %190 }
  0xbf   :  { %v236_v20 = vpop.xlane.xlu0 %235 }
  0xdf   :  { %v291_v25 = vpop.f32.mrb[0].mxu0  ;;  %v294_v26 = vpop.f32.mrb[0].mxu1 }
  0xe0   :  { %v148_v27 = vadd.f32 %v291_v25, %v51_v23  ;;  %v158_v28 = vadd.f32 %v294_v26, %v61_v24  ;;  %v142_v29 = vpop.f32.mrb[1].mxu0  ;;  %v152_v30 = vpop.f32.mrb[1].mxu1  ;;  %v248_v26 = vsel %vm247_vm9, %v236_v20, 0.0 }
  0xe1   :  { %v143_v32 = vadd.f32 %v142_v29, %v46_v21  ;;  %v153_v33 = vadd.f32 %v152_v30, %v56_v22 }
  0xe2   :  { %vm162_vm2 = vcmp.gt.f32.partialorder %v148_v27, 0.0  ;;  %v166_v34 = vmul.f32 0.2, %v148_v27  ;;  %v168_v35 = vmul.f32 0.2, %v158_v28  ;;  %vm164_vm5 = vcmp.gt.f32.partialorder %v158_v28, 0.0 }
  0xe3   :  { %vm161_vm3 = vcmp.gt.f32.partialorder %v143_v32, 0.0  ;;  %v165_v37 = vmul.f32 0.2, %v143_v32  ;;  %vm163_vm4 = vcmp.gt.f32.partialorder %v153_v33, 0.0  ;;  %v167_v38 = vmul.f32 0.2, %v153_v33 }
  0xe4   :  { %v170_v39 = vsel %vm162_vm2, %v148_v27, %v166_v34  ;;  %v172_v45 = vsel %vm164_vm5, %v158_v28, %v168_v35 }
  0xe5   :  { %v194_v40 = vmul.f32 %v181_v36, %v170_v39  ;;  %v169_v41 = vsel %vm161_vm3, %v143_v32, %v165_v37  ;;  %v171_v42 = vsel %vm163_vm4, %v153_v33, %v167_v38  ;;  %v196_v49 = vmul.f32 %v191_v48, %v172_v45 }
  0xe6   :  { %v193_v43 = vmul.f32 %v176_v31, %v169_v41  ;;  %v195_v47 = vmul.f32 %v186_v44, %v171_v42 }
  0xe8   :  { %v197_v46 = vadd.f32 %v194_v40, %v193_v43 }
  0xea   :  { %v198_v50 = vadd.f32 %v197_v46, %v195_v47 }
  0xec   :  { %v199_v51 = vadd.f32 %v198_v50, %v196_v49 }
  0xee   :  { %v200_v52 = vrot.slane %v199_v51, 4 }
  0xf0   :  { %v201_v53 = vadd.f32 %v200_v52, %v199_v51 }
  0xf2   :  { %v202_v54 = vrot.slane %v201_v53, 2 }
  0xf4   :  { %v203_v55 = vadd.f32 %v202_v54, %v201_v53 }
  0xf6   :  { %v204_v56 = vrot.slane %v203_v55, 1 }
  0xf8   :  { %v205_v58 = vadd.f32 %v204_v56, %v203_v55 }
  0xfa   :  { %v207_v59 = vadd.f32 %v206_v57, %v205_v58 }
  0xfc   :  { %vm224_vm6 = vcmp.gt.f32.partialorder %v207_v59, 0.0  ;;  %v210_v60 = vand.u32 2147483647, %v207_v59  ;;  %v208_v3 = vsub.f32 0.0, %v207_v59 }
  0xfd   :  { %v272_v62 = vsel %vm224_vm6, 1.0, %v341_v61 }
  0xfe   :  { %232 = vadd.xlane.f32.xlu1 %v272_v62  ;;  %v211_v63 = vsub.f32 0.0, %v210_v60  ;;  %v209_v5 = vmax.f32 %v208_v3, 0.0  ;;  %v227_v14 = vmul.f32 %v272_v62, %v433_v19 }
 0x100   :  { %v212_v0 = vmul.f32 1.442695, %v211_v63  ;;  %v237_v16 = vsel %vm228_vm1, %v227_v14, 0.0 }
 0x102   :  { %312 = vpow2.f32 %v212_v0 }
 0x10c   :  { %v313_v1 = vpop.eup %312 }
 0x10d   :  { %v214_v2 = vadd.f32 1.0, %v313_v1 }
 0x10f   :  { %314 = vlog2.f32 %v214_v2 }
 0x119   :  { %v315_v4 = vpop.eup %314 }
 0x11a   :  { %v216_v6 = vmul.f32 0.6931472, %v315_v4 }
 0x11c   :  { %v217_v7 = vadd.f32 %v216_v6, %v209_v5 }
 0x11e   :  { %v221_v10 = vadd.f32 %v217_v7, %v207_v59  ;;  %v219_v11 = vmul.f32 %v218_v8, %v217_v7 }
 0x120   :  { %v222_v12 = vmul.f32 %v221_v10, %v220_v9 }
 0x122   :  { %v223_v13 = vadd.f32 %v222_v12, %v219_v11 }
 0x124   :  { %v229_v15 = vsel %vm228_vm1, %v223_v13, 0.0 }
 0x125   :  { %230 = vadd.xlane.f32.xlu0 %v229_v15 }
 0x129   :  { %238 = vadd.xlane.f32.xlu0 %v237_v16 }
 0x18b   :  { %v233_v21 = vpop.xlane.xlu1 %232 }
 0x18c   :  { %v245_v23 = vsel %vm244_vm7, %v233_v21, 0.0 }
 0x1b2   :  { %v231_v22 = vpop.xlane.xlu0 %230 }
 0x1b3   :  { %v243_v24 = vsel %vm242_vm8, %v231_v22, 0.0 }
 0x1b4   :  { %v246_v25 = vadd.f32 %v245_v23, %v243_v24 }
 0x1b6   :  { %v249_v19 = vadd.f32 %v248_v26, %v246_v25  ;;  %v239_v27 = vpop.xlane.xlu0 %238 }
 0x1b7   :  { %v251_v28 = vsel %vm250_vm10, %v239_v27, 0.0 }
 0x1b8   :  { %v252_v29 = vadd.f32 %v251_v28, %v249_v19 }
 0x1ba   :  { %253 = vst [vmem:[#allocation3] sm:$0x1] %v252_v29 }
 0x1bb   :  { %327 = shalt.err (!%p324_p4)
}
 0x1bc   :  { %s328_s9 = scalar_lea.hbm %s463_s6, 16 }
 0x1bd   :  { %p329_p5 = scmp.ne.s32.totalorder %s463_s6, %s328_s9  ;;  %p332_p6 = scmp.lt.u32.totalorder %s328_s9, %s463_s6 }
 0x1bf   :  { %p334_p7 = pnand %p332_p6, %p329_p5 }
 0x1c1   :  { %337 = shalt.err (!%p334_p7)
}
 0x1c2   :  { %263 = dma.vmem_to_hbm [thread:$0]  %s261_s28, 16, %s463_s6, [#allocation4]  }
 0x1c3   :  { %338 = dma.done.wait [#allocation4], 16  }
 0x1c4   :  { %339 = vsyncadd [#allocation4], 4294967280 }
 0x1c5   :  { %267 = vsyncpa [#allocation4], 1 }

</bundles_post_ra>
